<compile_context>
chip_gen: v7x
topology: tpu7x:2x2x1
jax: 0.10.0
libtpu: 0.0.40
codegen_flags: <defaults>
</compile_context>

<pallas_src>
import jax
import jax.numpy as jnp
from jax.experimental import pallas as pl
from jax.experimental.pallas import tpu as pltpu

BN_EPS = 1e-5


def _round_up(x, m):
    return (x + m - 1) // m * m


# ---------------------------------------------------------------------------
# Kernel: x -> [Linear(+folded BN) -> ReLU] * n_hidden -> merged mu|logvar head
# Argument order: x_ref, W_0 ... W_{n_layers-1}, bias_pack_ref, out_ref.
# ---------------------------------------------------------------------------
def _make_dense_encoder_kernel(n_layers: int):
    def kernel(x_ref, *refs):
        out_ref = refs[-1]
        bias_ref = refs[-2]
        w_refs = refs[:-2]

        cdt = x_ref.dtype
        h = x_ref[...]                                   # [TB, in_pad]
        for i in range(n_layers):
            w = w_refs[i][...]                           # [in_pad_i, out_pad_i]
            b = bias_ref[i : i + 1, : w.shape[1]]        # [1, out_pad_i], f32
            z = jnp.dot(h, w, preferred_element_type=jnp.float32) + b
            if i < n_layers - 1:
                h = jnp.maximum(z, 0.0).astype(cdt)      # ReLU, back to MXU dtype
            else:
                out_ref[...] = z.astype(out_ref.dtype)   # merged mu|logvar head

    return kernel


# ---------------------------------------------------------------------------
# One-time parameter preparation (hoisted out of the per-call forward path).
# ---------------------------------------------------------------------------
def prepare_encoder_params(params, compute_dtype=jnp.bfloat16):
    """Fold eval-mode BN into each Linear (f32), merge mu/logvar heads,
    zero-pad feature dims to 128 lanes, cast weights to compute_dtype and pack
    all per-layer biases into ONE [n_layers, F_max] f32 array."""
    n_hidden = len(params["hidden"])
    n_layers = n_hidden + 1

    folded_ws, folded_bs = [], []
    for layer in params["hidden"]:
        scale = layer["gamma"] * jax.lax.rsqrt(layer["var"] + BN_EPS)       # [1, out]
        folded_ws.append(layer["w"] * scale)                                # f32 fold
        folded_bs.append((layer["b"] - layer["mean"]) * scale + layer["beta"])
    folded_ws.append(jnp.concatenate([params["mu"]["w"], params["logvar"]["w"]], axis=1))
    folded_bs.append(jnp.concatenate([params["mu"]["b"], params["logvar"]["b"]], axis=1))

    in_pads = [_round_up(w.shape[0], 128) for w in folded_ws]
    out_pads = [_round_up(w.shape[1], 128) for w in folded_ws]
    f_max = max(out_pads)

    padded_ws = [
        jnp.pad(w, ((0, ip - w.shape[0]), (0, op - w.shape[1]))).astype(compute_dtype)
        for w, ip, op in zip(folded_ws, in_pads, out_pads)
    ]
    bias_pack = jnp.stack(
        [jnp.pad(b[0].astype(jnp.float32), (0, f_max - b.shape[1])) for b in folded_bs]
    )

    return dict(
        ws=[jax.device_put(w) for w in padded_ws],
        bias_pack=jax.device_put(bias_pack),
        in_pads=in_pads,
        out_pads=out_pads,
        n_layers=n_layers,
        latent=params["mu"]["w"].shape[1],
        input_size=params["hidden"][0]["w"].shape[0],
        compute_dtype=jnp.dtype(compute_dtype),
    )


def _pick_batch_tile(batch, compute_dtype):
    # Keep >=2 grid steps where possible so dimension_semantics=("parallel",)
    # can shard the batch across v7x's two TensorCores; large batches get
    # bigger tiles to amortize the ~0.35us/step overhead.
    if batch >= 1024:
        return 512
    if batch >= 512:
        return 256
    if batch >= 128:
        return 128
    # Small batch: bf16 packs 16 rows per sublane group, f32 packs 8.
    mult = 16 if jnp.dtype(compute_dtype).itemsize < 4 else 8
    return _round_up(batch, mult)


def _vmem_cap_bytes():
    # Hardware-aware VMEM ceiling: ~12-16 MiB headroom under physical capacity
    # (64 MiB on v7x, 128 MiB on v5e/v6e).
    try:
        cap = int(pltpu.get_tpu_info().vmem_capacity_bytes)
    except Exception:
        cap = 64 << 20  # conservative (v7x-sized) fallback
    return max(16 << 20, min(cap - (12 << 20), int(0.85 * cap)))


# ---------------------------------------------------------------------------
# Forward pass.
# ---------------------------------------------------------------------------
def dense_encoder_forward(x, prepared):
    """x: [batch, input_size] f32.  prepared: output of prepare_encoder_params.
    Returns (mu, logvar), each [batch, latent] f32."""
    batch, input_size = x.shape
    assert input_size == prepared["input_size"]
    cdt = prepared["compute_dtype"]
    ws = prepared["ws"]
    bias_pack = prepared["bias_pack"]
    in_pads, out_pads = prepared["in_pads"], prepared["out_pads"]
    n_layers = prepared["n_layers"]
    latent = prepared["latent"]
    head_pad = out_pads[-1]

    tb = _pick_batch_tile(batch, cdt)
    batch_pad = _round_up(batch, tb)
    # Single fused pad (no zeros + dynamic-update-slice double materialization).
    x_pad = jnp.pad(
        x.astype(cdt), ((0, batch_pad - batch), (0, in_pads[0] - input_size))
    )
    grid = (batch_pad // tb,)

    # Scheduler hint.
    flops = 2 * batch_pad * sum(ip * op for ip, op in zip(in_pads, out_pads))
    bytes_accessed = (
        x_pad.size * x_pad.dtype.itemsize
        + sum(int(w.size) * w.dtype.itemsize for w in ws)
        + int(bias_pack.size) * 4
        + batch_pad * head_pad * 4
    )
    cost = pl.CostEstimate(flops=flops, transcendentals=0, bytes_accessed=bytes_accessed)

    def run(weight_buffers):
        # weight_buffers = VMEM buffer count for the constant-index (resident)
        # weight / bias blocks: 1 when Buffered(1) is supported, else 2.
        pm = {}
        if weight_buffers == 1:
            pm = dict(pipeline_mode=pl.Buffered(1))

        in_specs = [pl.BlockSpec((tb, in_pads[0]), lambda i: (i, 0))]
        for w in ws:
            in_specs.append(pl.BlockSpec(w.shape, lambda i: (0, 0), **pm))
        in_specs.append(pl.BlockSpec(bias_pack.shape, lambda i: (0, 0), **pm))
        out_specs = pl.BlockSpec((tb, head_pad), lambda i: (i, 0))

        # VMEM budget: buffer-count-aware resident weights/biases +
        # double-buffered x/out tiles, with headroom; clamped per chip.
        item = jnp.dtype(cdt).itemsize
        resident = weight_buffers * (
            sum(int(w.size) * w.dtype.itemsize for w in ws) + int(bias_pack.size) * 4
        )
        tiles = 2 * (tb * in_pads[0] * item + tb * head_pad * 4)
        vmem_limit = int(1.25 * (resident + tiles)) + (4 << 20)
        vmem_limit = max(16 << 20, min(vmem_limit, _vmem_cap_bytes()))

        out = pl.pallas_call(
            _make_dense_encoder_kernel(n_layers),
            out_shape=jax.ShapeDtypeStruct((batch_pad, head_pad), jnp.float32),
            grid=grid,
            in_specs=in_specs,
            out_specs=out_specs,
            compiler_params=pltpu.CompilerParams(
                dimension_semantics=("parallel",),
                vmem_limit_bytes=vmem_limit,
            ),
            cost_estimate=cost,
        )(x_pad, *ws, bias_pack)
        return jax.block_until_ready(out)

    if hasattr(pl, "Buffered"):
        try:
            out = run(1)
        except Exception:
            out = run(2)  # fallback: default double-buffered resident blocks
    else:
        out = run(2)

    mu = out[:batch, :latent]
    logvar = out[:batch, latent : 2 * latent]
    return mu, logvar


# ---------------------------------------------------------------------------
# Synthetic params + pure-JAX reference.
# ---------------------------------------------------------------------------
def init_params(key, input_size, hidden_sizes, latent_size):
    """Deterministic synthetic parameter init (shapes match nn.Module.__init__)."""
    params = {"hidden": []}
    sizes = [input_size] + list(hidden_sizes)
    for i in range(1, len(sizes)):
        fan_in, fan_out = sizes[i - 1], sizes[i]
        key, k_w, k_b, k_g, k_bn, k_m, k_v = jax.random.split(key, 7)
        params["hidden"].append(
            dict(
                # stored as [in, out] (transpose of torch Linear.weight)
                w=jax.random.normal(k_w, (fan_in, fan_out), jnp.float32)
                * (1.0 / jnp.sqrt(fan_in)),
                b=jax.random.normal(k_b, (1, fan_out), jnp.float32) * 0.01,
                gamma=1.0 + 0.1 * jax.random.normal(k_g, (1, fan_out), jnp.float32),
                beta=0.1 * jax.random.normal(k_bn, (1, fan_out), jnp.float32),
                mean=0.05 * jax.random.normal(k_m, (1, fan_out), jnp.float32),
                var=1.0 + 0.1 * jax.random.uniform(k_v, (1, fan_out), jnp.float32),
            )
        )
    last = hidden_sizes[-1]
    key, k1, k2, k3, k4 = jax.random.split(key, 5)
    params["mu"] = dict(
        w=jax.random.normal(k1, (last, latent_size), jnp.float32)
        * (1.0 / jnp.sqrt(last)),
        b=jax.random.normal(k2, (1, latent_size), jnp.float32) * 0.01,
    )
    params["logvar"] = dict(
        w=jax.random.normal(k3, (last, latent_size), jnp.float32)
        * (1.0 / jnp.sqrt(last)),
        b=jax.random.normal(k4, (1, latent_size), jnp.float32) * 0.01,
    )
    return params


def dense_encoder_reference(x, params):
    """Pure-JAX f32 reference of the same forward pass (eval-mode BN)."""
    h = x
    for layer in params["hidden"]:
        h = h @ layer["w"] + layer["b"]
        h = (h - layer["mean"]) / jnp.sqrt(layer["var"] + BN_EPS)
        h = h * layer["gamma"] + layer["beta"]
        h = jnp.maximum(h, 0.0)
    mu = h @ params["mu"]["w"] + params["mu"]["b"]
    logvar = h @ params["logvar"]["w"] + params["logvar"]["b"]
    return mu, logvar


if __name__ == "__main__":
    # Small shapes consistent with the module's assertions:
    #   hidden sizes monotonically decreasing, latent < last hidden,
    #   input_size >= first hidden size.
    batch = 8
    input_size = 64
    hidden_sizes = [48, 32]
    latent_size = 16

    key = jax.random.PRNGKey(0)
    key, k_x = jax.random.split(key)
    x = jax.random.normal(k_x, (batch, input_size), jnp.float32)
    params = init_params(key, input_size, hidden_sizes, latent_size)

    mu_ref, logvar_ref = dense_encoder_reference(x, params)

    # f32 path: tight correctness check (only BN-fold reassociation differences).
    prep_f32 = prepare_encoder_params(params, compute_dtype=jnp.float32)
    mu32, lv32 = dense_encoder_forward(x, prep_f32)
    jax.block_until_ready((mu32, lv32))
    assert mu32.shape == (batch, latent_size) and lv32.shape == (batch, latent_size)
    assert jnp.allclose(mu32, mu_ref, atol=1e-4, rtol=1e-4)
    assert jnp.allclose(lv32, logvar_ref, atol=1e-4, rtol=1e-4)

    # bf16 path (default, fast MXU path): looser tolerance for bf16 operands.
    prep_bf16 = prepare_encoder_params(params, compute_dtype=jnp.bfloat16)
    mu, logvar = dense_encoder_forward(x, prep_bf16)
    jax.block_until_ready((mu, logvar))
    assert mu.shape == (batch, latent_size) and logvar.shape == (batch, latent_size)
    assert jnp.allclose(mu, mu_ref, atol=5e-2, rtol=5e-2)
    assert jnp.allclose(logvar, logvar_ref, atol=5e-2, rtol=5e-2)

    print("KERNEL_OK")
</pallas_src>

<mosaic_0001>
module attributes {stable_mosaic.version = 11 : i64} {
  func.func @kernel(%arg0: i32, %arg1: memref<8x128xf32, #tpu.memory_space<vmem>>, %arg2: memref<128x128xf32, #tpu.memory_space<vmem>>, %arg3: memref<128x128xf32, #tpu.memory_space<vmem>>, %arg4: memref<128x128xf32, #tpu.memory_space<vmem>>, %arg5: memref<3x128xf32, #tpu.memory_space<vmem>>, %arg6: memref<8x128xf32, #tpu.memory_space<vmem>>) attributes {dimension_semantics = [#tpu.dimension_semantics<parallel>], iteration_bounds = array<i64: 1>, scalar_prefetch = 0 : i64, scratch_operands = 0 : i64, tpu.core_type = #tpu.core_type<tc>, window_params = [{transform_indices = @transform_0, window_bounds = array<i64: 8, 128>}, {pipeline_mode = #tpu.pipeline_mode<synchronous>, transform_indices = @transform_1, window_bounds = array<i64: 128, 128>}, {pipeline_mode = #tpu.pipeline_mode<synchronous>, transform_indices = @transform_2, window_bounds = array<i64: 128, 128>}, {pipeline_mode = #tpu.pipeline_mode<synchronous>, transform_indices = @transform_3, window_bounds = array<i64: 128, 128>}, {pipeline_mode = #tpu.pipeline_mode<synchronous>, transform_indices = @transform_4, window_bounds = array<i64: 3, 128>}, {transform_indices = @transform_5, window_bounds = array<i64: 8, 128>}]} {
    %c0 = arith.constant 0 : index
    %c0_0 = arith.constant 0 : index
    %0 = vector.load %arg1[%c0, %c0_0] : memref<8x128xf32, #tpu.memory_space<vmem>>, vector<8x128xf32>
    %c0_1 = arith.constant 0 : index
    %c0_2 = arith.constant 0 : index
    %1 = vector.load %arg2[%c0_1, %c0_2] : memref<128x128xf32, #tpu.memory_space<vmem>>, vector<128x128xf32>
    %c0_3 = arith.constant 0 : index
    %c0_4 = arith.constant 0 : index
    %2 = vector.load %arg5[%c0_3, %c0_4] : memref<3x128xf32, #tpu.memory_space<vmem>>, vector<1x128xf32>
    %cst = arith.constant dense<0.000000e+00> : vector<8x128xf32>
    %3 = tpu.matmul %0, %1, %cst {dimension_numbers = #tpu.dot_dimension_numbers<[1], [0], [0], [1], [0, 0, 1, 1], [], []>} : vector<8x128xf32>, vector<128x128xf32>, vector<8x128xf32> -> vector<8x128xf32>
    %4 = vector.broadcast %2 : vector<1x128xf32> to vector<8x128xf32>
    %5 = arith.addf %3, %4 : vector<8x128xf32>
    %cst_5 = arith.constant 0.000000e+00 : f32
    %6 = vector.broadcast %cst_5 : f32 to vector<8x128xf32>
    %7 = arith.maximumf %5, %6 : vector<8x128xf32>
    %c0_6 = arith.constant 0 : index
    %c0_7 = arith.constant 0 : index
    %8 = vector.load %arg3[%c0_6, %c0_7] : memref<128x128xf32, #tpu.memory_space<vmem>>, vector<128x128xf32>
    %c1 = arith.constant 1 : index
    %c0_8 = arith.constant 0 : index
    %9 = vector.load %arg5[%c1, %c0_8] : memref<3x128xf32, #tpu.memory_space<vmem>>, vector<1x128xf32>
    %cst_9 = arith.constant dense<0.000000e+00> : vector<8x128xf32>
    %10 = tpu.matmul %7, %8, %cst_9 {dimension_numbers = #tpu.dot_dimension_numbers<[1], [0], [0], [1], [0, 0, 1, 1], [], []>} : vector<8x128xf32>, vector<128x128xf32>, vector<8x128xf32> -> vector<8x128xf32>
    %11 = vector.broadcast %9 : vector<1x128xf32> to vector<8x128xf32>
    %12 = arith.addf %10, %11 : vector<8x128xf32>
    %cst_10 = arith.constant 0.000000e+00 : f32
    %13 = vector.broadcast %cst_10 : f32 to vector<8x128xf32>
    %14 = arith.maximumf %12, %13 : vector<8x128xf32>
    %c0_11 = arith.constant 0 : index
    %c0_12 = arith.constant 0 : index
    %15 = vector.load %arg4[%c0_11, %c0_12] : memref<128x128xf32, #tpu.memory_space<vmem>>, vector<128x128xf32>
    %c2 = arith.constant 2 : index
    %c0_13 = arith.constant 0 : index
    %16 = vector.load %arg5[%c2, %c0_13] : memref<3x128xf32, #tpu.memory_space<vmem>>, vector<1x128xf32>
    %cst_14 = arith.constant dense<0.000000e+00> : vector<8x128xf32>
    %17 = tpu.matmul %14, %15, %cst_14 {dimension_numbers = #tpu.dot_dimension_numbers<[1], [0], [0], [1], [0, 0, 1, 1], [], []>} : vector<8x128xf32>, vector<128x128xf32>, vector<8x128xf32> -> vector<8x128xf32>
    %18 = vector.broadcast %16 : vector<1x128xf32> to vector<8x128xf32>
    %19 = arith.addf %17, %18 : vector<8x128xf32>
    %c0_15 = arith.constant 0 : index
    %c0_16 = arith.constant 0 : index
    %20 = vector.load %arg6[%c0_15, %c0_16] : memref<8x128xf32, #tpu.memory_space<vmem>>, vector<8x128xf32>
    tpu.vector_store %arg6[%c0_15, %c0_16], %19 {strides = array<i32>} : memref<8x128xf32, #tpu.memory_space<vmem>>, vector<8x128xf32>,
    return
  }
  func.func @transform_0(%arg0: i32) -> (i32, i32) {
    %c0_i32 = arith.constant 0 : i32
    %c0_i32_0 = arith.constant 0 : i32
    return %arg0, %c0_i32 : i32, i32
  }
  func.func @transform_1(%arg0: i32) -> (i32, i32) {
    %c0_i32 = arith.constant 0 : i32
    %c0_i32_0 = arith.constant 0 : i32
    %c0_i32_1 = arith.constant 0 : i32
    return %c0_i32, %c0_i32_0 : i32, i32
  }
  func.func @transform_2(%arg0: i32) -> (i32, i32) {
    %c0_i32 = arith.constant 0 : i32
    %c0_i32_0 = arith.constant 0 : i32
    %c0_i32_1 = arith.constant 0 : i32
    return %c0_i32, %c0_i32_0 : i32, i32
  }
  func.func @transform_3(%arg0: i32) -> (i32, i32) {
    %c0_i32 = arith.constant 0 : i32
    %c0_i32_0 = arith.constant 0 : i32
    %c0_i32_1 = arith.constant 0 : i32
    return %c0_i32, %c0_i32_0 : i32, i32
  }
  func.func @transform_4(%arg0: i32) -> (i32, i32) {
    %c0_i32 = arith.constant 0 : i32
    %c0_i32_0 = arith.constant 0 : i32
    %c0_i32_1 = arith.constant 0 : i32
    return %c0_i32, %c0_i32_0 : i32, i32
  }
  func.func @transform_5(%arg0: i32) -> (i32, i32) {
    %c0_i32 = arith.constant 0 : i32
    %c0_i32_0 = arith.constant 0 : i32
    return %arg0, %c0_i32 : i32, i32
  }
}

module attributes {stable_mosaic.version = 11 : i64} {
  func.func @kernel(%arg0: i32, %arg1: memref<8x128xf32, #tpu.memory_space<vmem>>, %arg2: memref<128x128xf32, #tpu.memory_space<vmem>>, %arg3: memref<128x128xf32, #tpu.memory_space<vmem>>, %arg4: memref<128x128xf32, #tpu.memory_space<vmem>>, %arg5: memref<3x128xf32, #tpu.memory_space<vmem>>, %arg6: memref<8x128xf32, #tpu.memory_space<vmem>>) attributes {dimension_semantics = [#tpu.dimension_semantics<parallel>], iteration_bounds = array<i64: 1>, scalar_prefetch = 0 : i64, scratch_operands = 0 : i64, tpu.core_type = #tpu.core_type<tc>, window_params = [{transform_indices = @transform_0, window_bounds = array<i64: 8, 128>}, {pipeline_mode = #tpu.pipeline_mode<synchronous>, transform_indices = @transform_1, window_bounds = array<i64: 128, 128>}, {pipeline_mode = #tpu.pipeline_mode<synchronous>, transform_indices = @transform_2, window_bounds = array<i64: 128, 128>}, {pipeline_mode = #tpu.pipeline_mode<synchronous>, transform_indices = @transform_3, window_bounds = array<i64: 128, 128>}, {pipeline_mode = #tpu.pipeline_mode<synchronous>, transform_indices = @transform_4, window_bounds = array<i64: 3, 128>}, {transform_indices = @transform_5, window_bounds = array<i64: 8, 128>}]} {
    %c0 = arith.constant 0 : index
    %c0_0 = arith.constant 0 : index
    %0 = vector.load %arg1[%c0, %c0_0] : memref<8x128xf32, #tpu.memory_space<vmem>>, vector<8x128xf32>
    %c0_1 = arith.constant 0 : index
    %c0_2 = arith.constant 0 : index
    %1 = vector.load %arg2[%c0_1, %c0_2] : memref<128x128xf32, #tpu.memory_space<vmem>>, vector<128x128xf32>
    %c0_3 = arith.constant 0 : index
    %c0_4 = arith.constant 0 : index
    %2 = vector.load %arg5[%c0_3, %c0_4] : memref<3x128xf32, #tpu.memory_space<vmem>>, vector<1x128xf32>
    %cst = arith.constant dense<0.000000e+00> : vector<8x128xf32>
    %3 = tpu.matmul %0, %1, %cst {dimension_numbers = #tpu.dot_dimension_numbers<[1], [0], [0], [1], [0, 0, 1, 1], [], []>} : vector<8x128xf32>, vector<128x128xf32>, vector<8x128xf32> -> vector<8x128xf32>
    %4 = vector.broadcast %2 : vector<1x128xf32> to vector<8x128xf32>
    %5 = arith.addf %3, %4 : vector<8x128xf32>
    %cst_5 = arith.constant 0.000000e+00 : f32
    %6 = vector.broadcast %cst_5 : f32 to vector<8x128xf32>
    %7 = arith.maximumf %5, %6 : vector<8x128xf32>
    %c0_6 = arith.constant 0 : index
    %c0_7 = arith.constant 0 : index
    %8 = vector.load %arg3[%c0_6, %c0_7] : memref<128x128xf32, #tpu.memory_space<vmem>>, vector<128x128xf32>
    %c1 = arith.constant 1 : index
    %c0_8 = arith.constant 0 : index
    %9 = vector.load %arg5[%c1, %c0_8] : memref<3x128xf32, #tpu.memory_space<vmem>>, vector<1x128xf32>
    %cst_9 = arith.constant dense<0.000000e+00> : vector<8x128xf32>
    %10 = tpu.matmul %7, %8, %cst_9 {dimension_numbers = #tpu.dot_dimension_numbers<[1], [0], [0], [1], [0, 0, 1, 1], [], []>} : vector<8x128xf32>, vector<128x128xf32>, vector<8x128xf32> -> vector<8x128xf32>
    %11 = vector.broadcast %9 : vector<1x128xf32> to vector<8x128xf32>
    %12 = arith.addf %10, %11 : vector<8x128xf32>
    %cst_10 = arith.constant 0.000000e+00 : f32
    %13 = vector.broadcast %cst_10 : f32 to vector<8x128xf32>
    %14 = arith.maximumf %12, %13 : vector<8x128xf32>
    %c0_11 = arith.constant 0 : index
    %c0_12 = arith.constant 0 : index
    %15 = vector.load %arg4[%c0_11, %c0_12] : memref<128x128xf32, #tpu.memory_space<vmem>>, vector<128x128xf32>
    %c2 = arith.constant 2 : index
    %c0_13 = arith.constant 0 : index
    %16 = vector.load %arg5[%c2, %c0_13] : memref<3x128xf32, #tpu.memory_space<vmem>>, vector<1x128xf32>
    %cst_14 = arith.constant dense<0.000000e+00> : vector<8x128xf32>
    %17 = tpu.matmul %14, %15, %cst_14 {dimension_numbers = #tpu.dot_dimension_numbers<[1], [0], [0], [1], [0, 0, 1, 1], [], []>} : vector<8x128xf32>, vector<128x128xf32>, vector<8x128xf32> -> vector<8x128xf32>
    %18 = vector.broadcast %16 : vector<1x128xf32> to vector<8x128xf32>
    %19 = arith.addf %17, %18 : vector<8x128xf32>
    %c0_15 = arith.constant 0 : index
    %c0_16 = arith.constant 0 : index
    %20 = vector.load %arg6[%c0_15, %c0_16] : memref<8x128xf32, #tpu.memory_space<vmem>>, vector<8x128xf32>
    tpu.vector_store %arg6[%c0_15, %c0_16], %19 {strides = array<i32>} : memref<8x128xf32, #tpu.memory_space<vmem>>, vector<8x128xf32>,
    return
  }
  func.func @transform_0(%arg0: i32) -> (i32, i32) {
    %c0_i32 = arith.constant 0 : i32
    %c0_i32_0 = arith.constant 0 : i32
    return %arg0, %c0_i32 : i32, i32
  }
  func.func @transform_1(%arg0: i32) -> (i32, i32) {
    %c0_i32 = arith.constant 0 : i32
    %c0_i32_0 = arith.constant 0 : i32
    %c0_i32_1 = arith.constant 0 : i32
    return %c0_i32, %c0_i32_0 : i32, i32
  }
  func.func @transform_2(%arg0: i32) -> (i32, i32) {
    %c0_i32 = arith.constant 0 : i32
    %c0_i32_0 = arith.constant 0 : i32
    %c0_i32_1 = arith.constant 0 : i32
    return %c0_i32, %c0_i32_0 : i32, i32
  }
  func.func @transform_3(%arg0: i32) -> (i32, i32) {
    %c0_i32 = arith.constant 0 : i32
    %c0_i32_0 = arith.constant 0 : i32
    %c0_i32_1 = arith.constant 0 : i32
    return %c0_i32, %c0_i32_0 : i32, i32
  }
  func.func @transform_4(%arg0: i32) -> (i32, i32) {
    %c0_i32 = arith.constant 0 : i32
    %c0_i32_0 = arith.constant 0 : i32
    %c0_i32_1 = arith.constant 0 : i32
    return %c0_i32, %c0_i32_0 : i32, i32
  }
  func.func @transform_5(%arg0: i32) -> (i32, i32) {
    %c0_i32 = arith.constant 0 : i32
    %c0_i32_0 = arith.constant 0 : i32
    return %arg0, %c0_i32 : i32, i32
  }
}

</mosaic_0001>

<bundles_post_ra>
// kernel: tpu_custom_call.1
= control target key start
LH: loop header
LB: loop body
LE: loop exit
PB: predicated region body
PF: predicated region fallthrough
CT: control target
= control target key end

     0   :  { %10 = vsyncpa [#allocation3], 0  ;;  %s875_s0 = inlined_call_operand.hbm [shape: f32[8,128], index: 0, kind: input, shape index: {}]   ;;  %s876_s1 = inlined_call_operand.hbm [shape: f32[128,128], index: 1, kind: input, shape index: {}]   ;;  %s877_s2 = inlined_call_operand.hbm [shape: f32[128,128], index: 2, kind: input, shape index: {}]   ;;  %s878_s3 = inlined_call_operand.hbm [shape: f32[128,128], index: 3, kind: input, shape index: {}]   ;;  %s879_s4 = inlined_call_operand.vmem [shape: f32[3,128], index: 4, kind: input, shape index: {}]   ;;  %s880_s5 = inlined_call_operand.hbm [shape: f32[8,128], index: 5, kind: output, shape index: {}]  }
   0x1   :  { %11 = vsyncpa [#allocation6], 0 }
   0x2   :  { %12 = vsyncpa [#allocation9], 0 }
   0x3   :  { %13 = vsyncpa [#allocation4], 0  ;;  %s727_s18 = smov [#allocation5]   ;;  %s609_s22 = scalar_lea.hbm %s876_s1, 2048 }
   0x4   :  { %s29_s19 = sshll.u32 %s727_s18, 4  ;;  %p610_p0 = scmp.ne.s32.totalorder %s876_s1, %s609_s22  ;;  %s30_s19 = int_to_ptr.vmem [resolvable:$true] %s29_s19 }
   0x5   :  { %p613_p1 = scmp.lt.u32.totalorder %s609_s22, %s876_s1 }
   0x7   :  { %p615_p2 = pnand %p613_p1, %p610_p0 }
   0x9   :  { %618 = shalt.err (!%p615_p2)
}
   0xa   :  { %s619_s27 = scalar_lea.vmem %s30_s19, 2048  ;;  %p624_p4 = scmp.lt.s32.totalorder %s30_s19, %s30_s19 }
   0xb   :  { %p620_p3 = scmp.ne.s32.totalorder %s30_s19, %s619_s27  ;;  %p625_p5 = scmp.lt.s32.totalorder %s619_s27, %s619_s27 }
   0xd   :  { %p626_p6 = por %p625_p5, %p624_p4 }
   0xf   :  { %p627_p7 = pnand %p626_p6, %p620_p3 }
  0x11   :  { %630 = shalt.err (!%p627_p7)
}
  0x12   :  { %s728_s28 = smov 128   ;;  %s729_s29 = smov 8  }
  0x13   :  { %35 = dma.hbm_to_vmem [thread:$0]  %s876_s1, 2048, %s30_s19, [#allocation6], %s728_s28, %s728_s28, %s729_s29  }
  0x14   :  { %s730_s7 = smov [#allocation2]   ;;  %s731_s9 = smov [#allocation7]  }
  0x15   :  { %s20_s8 = sshll.u32 %s730_s7, 4  ;;  %s41_s10 = sshll.u32 %s731_s9, 4  ;;  %s21_s8 = int_to_ptr.vmem [resolvable:$true] %s20_s8  ;;  %s42_s10 = int_to_ptr.vmem [resolvable:$true] %s41_s10 }
  0x16   :  { %s631_s13 = scalar_lea.hbm %s875_s0, 128 }
  0x17   :  { %p632_p8 = scmp.ne.s32.totalorder %s875_s0, %s631_s13  ;;  %p635_p9 = scmp.lt.u32.totalorder %s631_s13, %s875_s0 }
  0x19   :  { %p637_p10 = pnand %p635_p9, %p632_p8 }
  0x1b   :  { %640 = shalt.err (!%p637_p10)
}
  0x1c   :  { %s641_s1 = scalar_lea.vmem %s21_s8, 128  ;;  %p646_p12 = scmp.lt.s32.totalorder %s21_s8, %s21_s8 }
  0x1d   :  { %p642_p11 = scmp.ne.s32.totalorder %s21_s8, %s641_s1  ;;  %p647_p13 = scmp.lt.s32.totalorder %s641_s1, %s641_s1 }
  0x1f   :  { %p648_p0 = por %p647_p13, %p646_p12 }
  0x21   :  { %p649_p1 = pnand %p648_p0, %p642_p11 }
  0x23   :  { %652 = shalt.err (!%p649_p1)
}
  0x24   :  { %23 = dma.hbm_to_vmem [thread:$0]  %s875_s0, 128, %s21_s8, [#allocation3]  }
  0x25   :  { %s653_s22 = scalar_lea.hbm %s877_s2, 2048 }
  0x26   :  { %p654_p2 = scmp.ne.s32.totalorder %s877_s2, %s653_s22  ;;  %p657_p3 = scmp.lt.u32.totalorder %s653_s22, %s877_s2 }
  0x28   :  { %p659_p4 = pnand %p657_p3, %p654_p2 }
  0x2a   :  { %662 = shalt.err (!%p659_p4)
}
  0x2b   :  { %s663_s27 = scalar_lea.vmem %s42_s10, 2048  ;;  %p668_p6 = scmp.lt.s32.totalorder %s42_s10, %s42_s10 }
  0x2c   :  { %p664_p5 = scmp.ne.s32.totalorder %s42_s10, %s663_s27  ;;  %p669_p7 = scmp.lt.s32.totalorder %s663_s27, %s663_s27 }
  0x2e   :  { %p670_p8 = por %p669_p7, %p668_p6 }
  0x30   :  { %p671_p9 = pnand %p670_p8, %p664_p5 }
  0x32   :  { %674 = shalt.err (!%p671_p9)
}
  0x33   :  { %47 = dma.hbm_to_vmem [thread:$0]  %s877_s2, 2048, %s42_s10, [#allocation6], %s728_s28, %s728_s28, %s729_s29  }
  0x34   :  { %s732_s6 = smov [#allocation8]   ;;  %s675_s11 = scalar_lea.hbm %s878_s3, 2048 }
  0x35   :  { %s53_s7 = sshll.u32 %s732_s6, 4  ;;  %p676_p10 = scmp.ne.s32.totalorder %s878_s3, %s675_s11  ;;  %s54_s7 = int_to_ptr.vmem [resolvable:$true] %s53_s7 }
  0x36   :  { %p679_p11 = scmp.lt.u32.totalorder %s675_s11, %s878_s3 }
  0x38   :  { %p681_p12 = pnand %p679_p11, %p676_p10 }
  0x3a   :  { %684 = shalt.err (!%p681_p12)
}
  0x3b   :  { %s685_s16 = scalar_lea.vmem %s54_s7, 2048  ;;  %p690_p0 = scmp.lt.s32.totalorder %s54_s7, %s54_s7 }
  0x3c   :  { %p686_p13 = scmp.ne.s32.totalorder %s54_s7, %s685_s16  ;;  %p691_p1 = scmp.lt.s32.totalorder %s685_s16, %s685_s16 }
  0x3e   :  { %p692_p2 = por %p691_p1, %p690_p0 }
  0x40   :  { %p693_p3 = pnand %p692_p2, %p686_p13 }
  0x42   :  { %696 = shalt.err (!%p693_p3)
}
  0x43   :  { %59 = dma.hbm_to_vmem [thread:$0]  %s878_s3, 2048, %s54_s7, [#allocation9], %s728_s28, %s728_s28, %s729_s29  }
  0x44   :  { %719 = dma.done.wait [#allocation3], 128  }
  0x45   :  { %720 = vsyncadd [#allocation3], 4294967168 }
  0x46   :  { %721 = dma.done.wait [#allocation6], 4096  }
  0x47   :  { %722 = vsyncadd [#allocation6], 4294963200 }
  0x48   :  { %723 = dma.done.wait [#allocation9], 2048  }
  0x49   :  { %724 = vsyncadd [#allocation9], 4294965248  ;;  %v733_v0 = vmov 0.0|0.0   ;;  %vm734_vm0 = vmmov 0   ;;  %v735_v1 = vmov 0.0   ;;  %v75_v2 = vld [vmem:[#allocation5] sm:$0xff] }
  0x4a   :  { %527 = vmatprep.subr.bf16.mxu0 %v733_v0  ;;  %454 = vmatprep.mubr.msk.f32.mxu0 %vm734_vm0, %v735_v1  ;;  %v76_v3 = vld [vmem:[#allocation5 + $0x8] sm:$0xff]  ;;  %v77_v4 = vld [vmem:[#allocation5 + $0x10] sm:$0xff]  ;;  %v78_v6 = vld [vmem:[#allocation5 + $0x18] sm:$0xff]  ;;  %s736_s19 = smov [#allocation10]  }
  0x4b   :  { %551 = vmatprep.subr.bf16.mxu1 %v733_v0  ;;  %489 = vmatprep.mubr.msk.f32.mxu1 %vm734_vm0, %v735_v1  ;;  %v528_v5 = vpack.c.bf16 %v76_v3, %v75_v2  ;;  %v531_v7 = vpack.c.bf16 %v78_v6, %v77_v4  ;;  %v79_v8 = vld [vmem:[#allocation5 + $0x20] sm:$0xff]  ;;  %v80_v9 = vld [vmem:[#allocation5 + $0x28] sm:$0xff]  ;;  %v169_v12 = vld [vmem:[#allocation7 + $0x10] sm:$0xff]  ;;  %s357_s20 = sshll.u32 %s736_s19, 4  ;;  %s358_s20 = int_to_ptr.vmem [resolvable:$true] %s357_s20 }
  0x4c   :  { %v167_v10 = vld [vmem:[#allocation7] sm:$0xff]  ;;  %v168_v11 = vld [vmem:[#allocation7 + $0x8] sm:$0xff]  ;;  %v170_v13 = vld [vmem:[#allocation7 + $0x18] sm:$0xff]  ;;  %v534_v14 = vpack.c.bf16 %v80_v9, %v79_v8  ;;  %s697_s21 = scalar_lea.vmem %s358_s20, 128  ;;  %p702_p5 = scmp.lt.s32.totalorder %s358_s20, %s358_s20 }
  0x4d   :  { %529 = vmatpush3.bf16.msra.mxu0 %v528_v5  ;;  %v552_v15 = vpack.c.bf16 %v168_v11, %v167_v10  ;;  %v81_v16 = vld [vmem:[#allocation5 + $0x30] sm:$0xff]  ;;  %v82_v17 = vld [vmem:[#allocation5 + $0x38] sm:$0xff]  ;;  %v555_v18 = vpack.c.bf16 %v170_v13, %v169_v12  ;;  %v171_v19 = vld [vmem:[#allocation7 + $0x20] sm:$0xff]  ;;  %p698_p4 = scmp.ne.s32.totalorder %s358_s20, %s697_s21  ;;  %p703_p6 = scmp.lt.s32.totalorder %s697_s21, %s697_s21 }
  0x4e   :  { %530 = vmatprep.subr.bf16.mxu0 %v733_v0  ;;  %v172_v20 = vld [vmem:[#allocation7 + $0x28] sm:$0xff]  ;;  %v537_v21 = vpack.c.bf16 %v82_v17, %v81_v16  ;;  %v83_v22 = vld [vmem:[#allocation5 + $0x40] sm:$0xff]  ;;  %v173_v25 = vld [vmem:[#allocation7 + $0x30] sm:$0xff] }
  0x4f   :  { %553 = vmatpush3.bf16.msra.mxu1 %v552_v15  ;;  %v84_v23 = vld [vmem:[#allocation5 + $0x48] sm:$0xff]  ;;  %v558_v24 = vpack.c.bf16 %v172_v20, %v171_v19  ;;  %v174_v26 = vld [vmem:[#allocation7 + $0x38] sm:$0xff]  ;;  %v85_v28 = vld [vmem:[#allocation5 + $0x50] sm:$0xff]  ;;  %p704_p7 = por %p703_p6, %p702_p5 }
  0x50   :  { %554 = vmatprep.subr.bf16.mxu1 %v733_v0  ;;  %v540_v27 = vpack.c.bf16 %v84_v23, %v83_v22  ;;  %v86_v29 = vld [vmem:[#allocation5 + $0x58] sm:$0xff]  ;;  %v561_v30 = vpack.c.bf16 %v174_v26, %v173_v25  ;;  %v175_v31 = vld [vmem:[#allocation7 + $0x40] sm:$0xff]  ;;  %v176_v32 = vld [vmem:[#allocation7 + $0x48] sm:$0xff] }
  0x51   :  { %532 = vmatpush3.bf16.msra.mxu0 %v531_v7  ;;  %v543_v33 = vpack.c.bf16 %v86_v29, %v85_v28  ;;  %v87_v34 = vld [vmem:[#allocation5 + $0x60] sm:$0xff]  ;;  %v88_v35 = vld [vmem:[#allocation5 + $0x68] sm:$0xff]  ;;  %v564_v36 = vpack.c.bf16 %v176_v32, %v175_v31  ;;  %v177_v37 = vld [vmem:[#allocation7 + $0x50] sm:$0xff]  ;;  %p705_p8 = pnand %p704_p7, %p698_p4 }
  0x52   :  { %533 = vmatprep.subr.bf16.mxu0 %v733_v0  ;;  %v178_v38 = vld [vmem:[#allocation7 + $0x58] sm:$0xff]  ;;  %v546_v39 = vpack.c.bf16 %v88_v35, %v87_v34  ;;  %v89_v40 = vld [vmem:[#allocation5 + $0x70] sm:$0xff]  ;;  %v179_v43 = vld [vmem:[#allocation7 + $0x60] sm:$0xff] }
  0x53   :  { %556 = vmatpush3.bf16.msra.mxu1 %v555_v18  ;;  %v90_v41 = vld [vmem:[#allocation5 + $0x78] sm:$0xff]  ;;  %v567_v42 = vpack.c.bf16 %v178_v38, %v177_v37  ;;  %v180_v44 = vld [vmem:[#allocation7 + $0x68] sm:$0xff]  ;;  %v181_v48 = vld [vmem:[#allocation7 + $0x70] sm:$0xff] }
  0x54   :  { %557 = vmatprep.subr.bf16.mxu1 %v733_v0  ;;  %v549_v45 = vpack.c.bf16 %v90_v41, %v89_v40  ;;  %v570_v46 = vpack.c.bf16 %v180_v44, %v179_v43  ;;  %v74_v47 = vld [vmem:[#allocation2] sm:$0xff]  ;;  %v259_v51 = vld [vmem:[#allocation8] sm:$0xff]  ;;  %v260_v52 = vld [vmem:[#allocation8 + $0x8] sm:$0xff] }
  0x55   :  { %535 = vmatpush3.bf16.msra.mxu0 %v534_v14  ;;  %v182_v49 = vld [vmem:[#allocation7 + $0x78] sm:$0xff]  ;;  %v261_v53 = vld [vmem:[#allocation8 + $0x10] sm:$0xff]  ;;  %v576_v54 = vpack.c.bf16 %v260_v52, %v259_v51  ;;  %v263_v57 = vld [vmem:[#allocation8 + $0x20] sm:$0xff] }
  0x56   :  { %536 = vmatprep.subr.bf16.mxu0 %v733_v0  ;;  %v573_v50 = vpack.c.bf16 %v182_v49, %v181_v48  ;;  %v262_v55 = vld [vmem:[#allocation8 + $0x18] sm:$0xff]  ;;  %v264_v58 = vld [vmem:[#allocation8 + $0x28] sm:$0xff]  ;;  %v265_v60 = vld [vmem:[#allocation8 + $0x30] sm:$0xff] }
  0x57   :  { %559 = vmatpush3.bf16.msra.mxu1 %v558_v24  ;;  %v579_v56 = vpack.c.bf16 %v262_v55, %v261_v53  ;;  %v582_v59 = vpack.c.bf16 %v264_v58, %v263_v57  ;;  %v266_v61 = vld [vmem:[#allocation8 + $0x38] sm:$0xff]  ;;  %v267_v63 = vld [vmem:[#allocation8 + $0x40] sm:$0xff]  ;;  %v269_v3 = vld [vmem:[#allocation8 + $0x50] sm:$0xff] }
  0x58   :  { %560 = vmatprep.subr.bf16.mxu1 %v733_v0  ;;  %v585_v62 = vpack.c.bf16 %v266_v61, %v265_v60  ;;  %v270_v4 = vld [vmem:[#allocation8 + $0x58] sm:$0xff]  ;;  %v271_v6 = vld [vmem:[#allocation8 + $0x60] sm:$0xff]  ;;  %v272_v7 = vld [vmem:[#allocation8 + $0x68] sm:$0xff] }
  0x59   :  { %538 = vmatpush3.bf16.msra.mxu0 %v537_v21  ;;  %v591_v5 = vpack.c.bf16 %v270_v4, %v269_v3  ;;  %v594_v8 = vpack.c.bf16 %v272_v7, %v271_v6  ;;  %v368_v9 = vld [vmem:[%s879_s4] ss:$0 sm:$0xff]  ;;  %v273_v14 = vld [vmem:[#allocation8 + $0x70] sm:$0xff]  ;;  %v369_v17 = vld [vmem:[%s879_s4 + $0x1] ss:$0 sm:$0xff] }
  0x5a   :  { %539 = vmatprep.subr.bf16.mxu0 %v733_v0  ;;  %v274_v15 = vld [vmem:[#allocation8 + $0x78] sm:$0xff] }
  0x5b   :  { %562 = vmatpush3.bf16.msra.mxu1 %v561_v30  ;;  %v597_v16 = vpack.c.bf16 %v274_v15, %v273_v14  ;;  %v370_v21 = vld [vmem:[%s879_s4 + $0x2] ss:$0 sm:$0xff] }
  0x5c   :  { %563 = vmatprep.subr.bf16.mxu1 %v733_v0 }
  0x5d   :  { %541 = vmatpush3.bf16.msra.mxu0 %v540_v27 }
  0x5e   :  { %542 = vmatprep.subr.bf16.mxu0 %v733_v0 }
  0x5f   :  { %565 = vmatpush3.bf16.msra.mxu1 %v564_v36 }
  0x60   :  { %566 = vmatprep.subr.bf16.mxu1 %v733_v0 }
  0x61   :  { %544 = vmatpush3.bf16.msra.mxu0 %v543_v33 }
  0x62   :  { %545 = vmatprep.subr.bf16.mxu0 %v733_v0 }
  0x63   :  { %568 = vmatpush3.bf16.msra.mxu1 %v567_v42 }
  0x64   :  { %569 = vmatprep.subr.bf16.mxu1 %v733_v0 }
  0x65   :  { %547 = vmatpush3.bf16.msra.mxu0 %v546_v39 }
  0x66   :  { %548 = vmatprep.subr.bf16.mxu0 %v733_v0 }
  0x67   :  { %571 = vmatpush3.bf16.msra.mxu1 %v570_v46 }
  0x68   :  { %572 = vmatprep.subr.bf16.mxu1 %v733_v0 }
  0x69   :  { %550 = vmatpush3.bf16.msra.mxu0 %v549_v45 }
  0x6a   :  { %575 = vmatprep.subr.bf16.mxu0 %v733_v0 }
  0x6b   :  { %574 = vmatpush3.bf16.msra.mxu1 %v573_v50 }
  0x6c   :  { %455 = vmatmul.mubr.f32.vlgmr.msra.gmra.mrb[0].mxu0 %v74_v47 }
  0x6d   :  { %524 = vmatprep.mubr.msk.f32.mxu0 %vm734_vm0, %v735_v1  ;;  %577 = vmatpush3.bf16.msra.mxu0 %v576_v54  ;;  %v268_v1 = vld [vmem:[#allocation8 + $0x48] sm:$0xff] }
  0x6e   :  { %578 = vmatprep.subr.bf16.mxu0 %v733_v0  ;;  %v588_v2 = vpack.c.bf16 %v268_v1, %v267_v63 }
  0x71   :  { %580 = vmatpush3.bf16.msra.mxu0 %v579_v56 }
  0x72   :  { %581 = vmatprep.subr.bf16.mxu0 %v733_v0 }
  0x75   :  { %583 = vmatpush3.bf16.msra.mxu0 %v582_v59 }
  0x76   :  { %584 = vmatprep.subr.bf16.mxu0 %v733_v0 }
  0x79   :  { %586 = vmatpush3.bf16.msra.mxu0 %v585_v62 }
  0x7a   :  { %587 = vmatprep.subr.bf16.mxu0 %v733_v0 }
  0x7d   :  { %589 = vmatpush3.bf16.msra.mxu0 %v588_v2 }
  0x7e   :  { %590 = vmatprep.subr.bf16.mxu0 %v733_v0 }
  0x81   :  { %592 = vmatpush3.bf16.msra.mxu0 %v591_v5 }
  0x82   :  { %593 = vmatprep.subr.bf16.mxu0 %v733_v0 }
  0x85   :  { %595 = vmatpush3.bf16.msra.mxu0 %v594_v8 }
  0x86   :  { %596 = vmatprep.subr.bf16.mxu0 %v733_v0 }
  0x89   :  { %598 = vmatpush3.bf16.msra.mxu0 %v597_v16 }
 0x13f   :  { %v162_v10 = vpop.f32.mrb[0].mxu0 }
 0x140   :  { %v163_v11 = vadd.f32 %v368_v9, %v162_v10  ;;  %v456_v12 = vpop.f32.mrb[1].mxu0 }
 0x142   :  { %v166_v13 = vmax.f32 %v163_v11, 0.0 }
 0x144   :  { %490 = vmatmul.mubr.f32.vlgmr.msra.gmra.mrb[0].mxu1 %v166_v13 }
 0x217   :  { %v254_v18 = vpop.f32.mrb[0].mxu1 }
 0x218   :  { %v255_v19 = vadd.f32 %v369_v17, %v254_v18  ;;  %v491_v0 = vpop.f32.mrb[1].mxu1 }
 0x21a   :  { %v258_v20 = vmax.f32 %v255_v19, 0.0 }
 0x21c   :  { %525 = vmatmul.mubr.f32.vlgmr.msra.gmra.mrb[2].mxu0 %v258_v20 }
 0x2ef   :  { %v346_v22 = vpop.f32.mrb[2].mxu0 }
 0x2f0   :  { %v347_v23 = vadd.f32 %v370_v21, %v346_v22  ;;  %v526_v24 = vpop.f32.mrb[3].mxu0 }
 0x2f2   :  { %350 = vst [vmem:[#allocation10] sm:$0xff] %v347_v23 }
 0x2f3   :  { %708 = shalt.err (!%p705_p8)
}
 0x2f4   :  { %s709_s24 = scalar_lea.hbm %s880_s5, 128 }
 0x2f5   :  { %p710_p9 = scmp.ne.s32.totalorder %s880_s5, %s709_s24  ;;  %p713_p10 = scmp.lt.u32.totalorder %s709_s24, %s880_s5 }
 0x2f7   :  { %p715_p11 = pnand %p713_p10, %p710_p9 }
 0x2f9   :  { %718 = shalt.err (!%p715_p11)
}
 0x2fa   :  { %360 = dma.vmem_to_hbm [thread:$0]  %s358_s20, 128, %s880_s5, [#allocation4]  }
 0x2fb   :  { %725 = dma.done.wait [#allocation4], 128  }
 0x2fc   :  { %726 = vsyncadd [#allocation4], 4294967168 }
 0x2fd   :  { %364 = vsyncpa [#allocation3], 1 }
 0x2fe   :  { %365 = vsyncpa [#allocation6], 1 }
 0x2ff   :  { %366 = vsyncpa [#allocation9], 1 }
 0x300   :  { %367 = vsyncpa [#allocation4], 1 }

// kernel: tpu_custom_call.1
= control target key start
LH: loop header
LB: loop body
LE: loop exit
PB: predicated region body
PF: predicated region fallthrough
CT: control target
= control target key end

     0   :  { %10 = vsyncpa [#allocation3], 0  ;;  %s875_s0 = inlined_call_operand.hbm [shape: f32[8,128], index: 0, kind: input, shape index: {}]   ;;  %s876_s1 = inlined_call_operand.hbm [shape: f32[128,128], index: 1, kind: input, shape index: {}]   ;;  %s877_s2 = inlined_call_operand.hbm [shape: f32[128,128], index: 2, kind: input, shape index: {}]   ;;  %s878_s3 = inlined_call_operand.hbm [shape: f32[128,128], index: 3, kind: input, shape index: {}]   ;;  %s879_s4 = inlined_call_operand.vmem [shape: f32[3,128], index: 4, kind: input, shape index: {}]   ;;  %s880_s5 = inlined_call_operand.hbm [shape: f32[8,128], index: 5, kind: output, shape index: {}]  }
   0x1   :  { %11 = vsyncpa [#allocation6], 0 }
   0x2   :  { %12 = vsyncpa [#allocation9], 0 }
   0x3   :  { %13 = vsyncpa [#allocation4], 0  ;;  %s727_s18 = smov [#allocation5]   ;;  %s609_s22 = scalar_lea.hbm %s876_s1, 2048 }
   0x4   :  { %s29_s19 = sshll.u32 %s727_s18, 4  ;;  %p610_p0 = scmp.ne.s32.totalorder %s876_s1, %s609_s22  ;;  %s30_s19 = int_to_ptr.vmem [resolvable:$true] %s29_s19 }
   0x5   :  { %p613_p1 = scmp.lt.u32.totalorder %s609_s22, %s876_s1 }
   0x7   :  { %p615_p2 = pnand %p613_p1, %p610_p0 }
   0x9   :  { %618 = shalt.err (!%p615_p2)
}
   0xa   :  { %s619_s27 = scalar_lea.vmem %s30_s19, 2048  ;;  %p624_p4 = scmp.lt.s32.totalorder %s30_s19, %s30_s19 }
   0xb   :  { %p620_p3 = scmp.ne.s32.totalorder %s30_s19, %s619_s27  ;;  %p625_p5 = scmp.lt.s32.totalorder %s619_s27, %s619_s27 }
   0xd   :  { %p626_p6 = por %p625_p5, %p624_p4 }
   0xf   :  { %p627_p7 = pnand %p626_p6, %p620_p3 }
  0x11   :  { %630 = shalt.err (!%p627_p7)
}
  0x12   :  { %s728_s28 = smov 128   ;;  %s729_s29 = smov 8  }
  0x13   :  { %35 = dma.hbm_to_vmem [thread:$0]  %s876_s1, 2048, %s30_s19, [#allocation6], %s728_s28, %s728_s28, %s729_s29  }
  0x14   :  { %s730_s7 = smov [#allocation2]   ;;  %s731_s9 = smov [#allocation7]  }
  0x15   :  { %s20_s8 = sshll.u32 %s730_s7, 4  ;;  %s41_s10 = sshll.u32 %s731_s9, 4  ;;  %s21_s8 = int_to_ptr.vmem [resolvable:$true] %s20_s8  ;;  %s42_s10 = int_to_ptr.vmem [resolvable:$true] %s41_s10 }
  0x16   :  { %s631_s13 = scalar_lea.hbm %s875_s0, 128 }
  0x17   :  { %p632_p8 = scmp.ne.s32.totalorder %s875_s0, %s631_s13  ;;  %p635_p9 = scmp.lt.u32.totalorder %s631_s13, %s875_s0 }
  0x19   :  { %p637_p10 = pnand %p635_p9, %p632_p8 }
  0x1b   :  { %640 = shalt.err (!%p637_p10)
}
  0x1c   :  { %s641_s1 = scalar_lea.vmem %s21_s8, 128  ;;  %p646_p12 = scmp.lt.s32.totalorder %s21_s8, %s21_s8 }
  0x1d   :  { %p642_p11 = scmp.ne.s32.totalorder %s21_s8, %s641_s1  ;;  %p647_p13 = scmp.lt.s32.totalorder %s641_s1, %s641_s1 }
  0x1f   :  { %p648_p0 = por %p647_p13, %p646_p12 }
  0x21   :  { %p649_p1 = pnand %p648_p0, %p642_p11 }
  0x23   :  { %652 = shalt.err (!%p649_p1)
}
  0x24   :  { %23 = dma.hbm_to_vmem [thread:$0]  %s875_s0, 128, %s21_s8, [#allocation3]  }
  0x25   :  { %s653_s22 = scalar_lea.hbm %s877_s2, 2048 }
  0x26   :  { %p654_p2 = scmp.ne.s32.totalorder %s877_s2, %s653_s22  ;;  %p657_p3 = scmp.lt.u32.totalorder %s653_s22, %s877_s2 }
  0x28   :  { %p659_p4 = pnand %p657_p3, %p654_p2 }
  0x2a   :  { %662 = shalt.err (!%p659_p4)
}
  0x2b   :  { %s663_s27 = scalar_lea.vmem %s42_s10, 2048  ;;  %p668_p6 = scmp.lt.s32.totalorder %s42_s10, %s42_s10 }
  0x2c   :  { %p664_p5 = scmp.ne.s32.totalorder %s42_s10, %s663_s27  ;;  %p669_p7 = scmp.lt.s32.totalorder %s663_s27, %s663_s27 }
  0x2e   :  { %p670_p8 = por %p669_p7, %p668_p6 }
  0x30   :  { %p671_p9 = pnand %p670_p8, %p664_p5 }
  0x32   :  { %674 = shalt.err (!%p671_p9)
}
  0x33   :  { %47 = dma.hbm_to_vmem [thread:$0]  %s877_s2, 2048, %s42_s10, [#allocation6], %s728_s28, %s728_s28, %s729_s29  }
  0x34   :  { %s732_s6 = smov [#allocation8]   ;;  %s675_s11 = scalar_lea.hbm %s878_s3, 2048 }
  0x35   :  { %s53_s7 = sshll.u32 %s732_s6, 4  ;;  %p676_p10 = scmp.ne.s32.totalorder %s878_s3, %s675_s11  ;;  %s54_s7 = int_to_ptr.vmem [resolvable:$true] %s53_s7 }
  0x36   :  { %p679_p11 = scmp.lt.u32.totalorder %s675_s11, %s878_s3 }
  0x38   :  { %p681_p12 = pnand %p679_p11, %p676_p10 }
  0x3a   :  { %684 = shalt.err (!%p681_p12)
}
  0x3b   :  { %s685_s16 = scalar_lea.vmem %s54_s7, 2048  ;;  %p690_p0 = scmp.lt.s32.totalorder %s54_s7, %s54_s7 }
  0x3c   :  { %p686_p13 = scmp.ne.s32.totalorder %s54_s7, %s685_s16  ;;  %p691_p1 = scmp.lt.s32.totalorder %s685_s16, %s685_s16 }
  0x3e   :  { %p692_p2 = por %p691_p1, %p690_p0 }
  0x40   :  { %p693_p3 = pnand %p692_p2, %p686_p13 }
  0x42   :  { %696 = shalt.err (!%p693_p3)
}
  0x43   :  { %59 = dma.hbm_to_vmem [thread:$0]  %s878_s3, 2048, %s54_s7, [#allocation9], %s728_s28, %s728_s28, %s729_s29  }
  0x44   :  { %719 = dma.done.wait [#allocation3], 128  }
  0x45   :  { %720 = vsyncadd [#allocation3], 4294967168 }
  0x46   :  { %721 = dma.done.wait [#allocation6], 4096  }
  0x47   :  { %722 = vsyncadd [#allocation6], 4294963200 }
  0x48   :  { %723 = dma.done.wait [#allocation9], 2048  }
  0x49   :  { %724 = vsyncadd [#allocation9], 4294965248  ;;  %v733_v0 = vmov 0.0|0.0   ;;  %vm734_vm0 = vmmov 0   ;;  %v735_v1 = vmov 0.0   ;;  %v75_v2 = vld [vmem:[#allocation5] sm:$0xff] }
  0x4a   :  { %527 = vmatprep.subr.bf16.mxu0 %v733_v0  ;;  %454 = vmatprep.mubr.msk.f32.mxu0 %vm734_vm0, %v735_v1  ;;  %v76_v3 = vld [vmem:[#allocation5 + $0x8] sm:$0xff]  ;;  %v77_v4 = vld [vmem:[#allocation5 + $0x10] sm:$0xff]  ;;  %v78_v6 = vld [vmem:[#allocation5 + $0x18] sm:$0xff]  ;;  %s736_s19 = smov [#allocation10]  }
  0x4b   :  { %551 = vmatprep.subr.bf16.mxu1 %v733_v0  ;;  %489 = vmatprep.mubr.msk.f32.mxu1 %vm734_vm0, %v735_v1  ;;  %v528_v5 = vpack.c.bf16 %v76_v3, %v75_v2  ;;  %v531_v7 = vpack.c.bf16 %v78_v6, %v77_v4  ;;  %v79_v8 = vld [vmem:[#allocation5 + $0x20] sm:$0xff]  ;;  %v80_v9 = vld [vmem:[#allocation5 + $0x28] sm:$0xff]  ;;  %v169_v12 = vld [vmem:[#allocation7 + $0x10] sm:$0xff]  ;;  %s357_s20 = sshll.u32 %s736_s19, 4  ;;  %s358_s20 = int_to_ptr.vmem [resolvable:$true] %s357_s20 }
  0x4c   :  { %v167_v10 = vld [vmem:[#allocation7] sm:$0xff]  ;;  %v168_v11 = vld [vmem:[#allocation7 + $0x8] sm:$0xff]  ;;  %v170_v13 = vld [vmem:[#allocation7 + $0x18] sm:$0xff]  ;;  %v534_v14 = vpack.c.bf16 %v80_v9, %v79_v8  ;;  %s697_s21 = scalar_lea.vmem %s358_s20, 128  ;;  %p702_p5 = scmp.lt.s32.totalorder %s358_s20, %s358_s20 }
  0x4d   :  { %529 = vmatpush3.bf16.msra.mxu0 %v528_v5  ;;  %v552_v15 = vpack.c.bf16 %v168_v11, %v167_v10  ;;  %v81_v16 = vld [vmem:[#allocation5 + $0x30] sm:$0xff]  ;;  %v82_v17 = vld [vmem:[#allocation5 + $0x38] sm:$0xff]  ;;  %v555_v18 = vpack.c.bf16 %v170_v13, %v169_v12  ;;  %v171_v19 = vld [vmem:[#allocation7 + $0x20] sm:$0xff]  ;;  %p698_p4 = scmp.ne.s32.totalorder %s358_s20, %s697_s21  ;;  %p703_p6 = scmp.lt.s32.totalorder %s697_s21, %s697_s21 }
  0x4e   :  { %530 = vmatprep.subr.bf16.mxu0 %v733_v0  ;;  %v172_v20 = vld [vmem:[#allocation7 + $0x28] sm:$0xff]  ;;  %v537_v21 = vpack.c.bf16 %v82_v17, %v81_v16  ;;  %v83_v22 = vld [vmem:[#allocation5 + $0x40] sm:$0xff]  ;;  %v173_v25 = vld [vmem:[#allocation7 + $0x30] sm:$0xff] }
  0x4f   :  { %553 = vmatpush3.bf16.msra.mxu1 %v552_v15  ;;  %v84_v23 = vld [vmem:[#allocation5 + $0x48] sm:$0xff]  ;;  %v558_v24 = vpack.c.bf16 %v172_v20, %v171_v19  ;;  %v174_v26 = vld [vmem:[#allocation7 + $0x38] sm:$0xff]  ;;  %v85_v28 = vld [vmem:[#allocation5 + $0x50] sm:$0xff]  ;;  %p704_p7 = por %p703_p6, %p702_p5 }
  0x50   :  { %554 = vmatprep.subr.bf16.mxu1 %v733_v0  ;;  %v540_v27 = vpack.c.bf16 %v84_v23, %v83_v22  ;;  %v86_v29 = vld [vmem:[#allocation5 + $0x58] sm:$0xff]  ;;  %v561_v30 = vpack.c.bf16 %v174_v26, %v173_v25  ;;  %v175_v31 = vld [vmem:[#allocation7 + $0x40] sm:$0xff]  ;;  %v176_v32 = vld [vmem:[#allocation7 + $0x48] sm:$0xff] }
  0x51   :  { %532 = vmatpush3.bf16.msra.mxu0 %v531_v7  ;;  %v543_v33 = vpack.c.bf16 %v86_v29, %v85_v28  ;;  %v87_v34 = vld [vmem:[#allocation5 + $0x60] sm:$0xff]  ;;  %v88_v35 = vld [vmem:[#allocation5 + $0x68] sm:$0xff]  ;;  %v564_v36 = vpack.c.bf16 %v176_v32, %v175_v31  ;;  %v177_v37 = vld [vmem:[#allocation7 + $0x50] sm:$0xff]  ;;  %p705_p8 = pnand %p704_p7, %p698_p4 }
  0x52   :  { %533 = vmatprep.subr.bf16.mxu0 %v733_v0  ;;  %v178_v38 = vld [vmem:[#allocation7 + $0x58] sm:$0xff]  ;;  %v546_v39 = vpack.c.bf16 %v88_v35, %v87_v34  ;;  %v89_v40 = vld [vmem:[#allocation5 + $0x70] sm:$0xff]  ;;  %v179_v43 = vld [vmem:[#allocation7 + $0x60] sm:$0xff] }
  0x53   :  { %556 = vmatpush3.bf16.msra.mxu1 %v555_v18  ;;  %v90_v41 = vld [vmem:[#allocation5 + $0x78] sm:$0xff]  ;;  %v567_v42 = vpack.c.bf16 %v178_v38, %v177_v37  ;;  %v180_v44 = vld [vmem:[#allocation7 + $0x68] sm:$0xff]  ;;  %v181_v48 = vld [vmem:[#allocation7 + $0x70] sm:$0xff] }
  0x54   :  { %557 = vmatprep.subr.bf16.mxu1 %v733_v0  ;;  %v549_v45 = vpack.c.bf16 %v90_v41, %v89_v40  ;;  %v570_v46 = vpack.c.bf16 %v180_v44, %v179_v43  ;;  %v74_v47 = vld [vmem:[#allocation2] sm:$0xff]  ;;  %v259_v51 = vld [vmem:[#allocation8] sm:$0xff]  ;;  %v260_v52 = vld [vmem:[#allocation8 + $0x8] sm:$0xff] }
  0x55   :  { %535 = vmatpush3.bf16.msra.mxu0 %v534_v14  ;;  %v182_v49 = vld [vmem:[#allocation7 + $0x78] sm:$0xff]  ;;  %v261_v53 = vld [vmem:[#allocation8 + $0x10] sm:$0xff]  ;;  %v576_v54 = vpack.c.bf16 %v260_v52, %v259_v51  ;;  %v263_v57 = vld [vmem:[#allocation8 + $0x20] sm:$0xff] }
  0x56   :  { %536 = vmatprep.subr.bf16.mxu0 %v733_v0  ;;  %v573_v50 = vpack.c.bf16 %v182_v49, %v181_v48  ;;  %v262_v55 = vld [vmem:[#allocation8 + $0x18] sm:$0xff]  ;;  %v264_v58 = vld [vmem:[#allocation8 + $0x28] sm:$0xff]  ;;  %v265_v60 = vld [vmem:[#allocation8 + $0x30] sm:$0xff] }
  0x57   :  { %559 = vmatpush3.bf16.msra.mxu1 %v558_v24  ;;  %v579_v56 = vpack.c.bf16 %v262_v55, %v261_v53  ;;  %v582_v59 = vpack.c.bf16 %v264_v58, %v263_v57  ;;  %v266_v61 = vld [vmem:[#allocation8 + $0x38] sm:$0xff]  ;;  %v267_v63 = vld [vmem:[#allocation8 + $0x40] sm:$0xff]  ;;  %v269_v3 = vld [vmem:[#allocation8 + $0x50] sm:$0xff] }
  0x58   :  { %560 = vmatprep.subr.bf16.mxu1 %v733_v0  ;;  %v585_v62 = vpack.c.bf16 %v266_v61, %v265_v60  ;;  %v270_v4 = vld [vmem:[#allocation8 + $0x58] sm:$0xff]  ;;  %v271_v6 = vld [vmem:[#allocation8 + $0x60] sm:$0xff]  ;;  %v272_v7 = vld [vmem:[#allocation8 + $0x68] sm:$0xff] }
  0x59   :  { %538 = vmatpush3.bf16.msra.mxu0 %v537_v21  ;;  %v591_v5 = vpack.c.bf16 %v270_v4, %v269_v3  ;;  %v594_v8 = vpack.c.bf16 %v272_v7, %v271_v6  ;;  %v368_v9 = vld [vmem:[%s879_s4] ss:$0 sm:$0xff]  ;;  %v273_v14 = vld [vmem:[#allocation8 + $0x70] sm:$0xff]  ;;  %v369_v17 = vld [vmem:[%s879_s4 + $0x1] ss:$0 sm:$0xff] }
  0x5a   :  { %539 = vmatprep.subr.bf16.mxu0 %v733_v0  ;;  %v274_v15 = vld [vmem:[#allocation8 + $0x78] sm:$0xff] }
  0x5b   :  { %562 = vmatpush3.bf16.msra.mxu1 %v561_v30  ;;  %v597_v16 = vpack.c.bf16 %v274_v15, %v273_v14  ;;  %v370_v21 = vld [vmem:[%s879_s4 + $0x2] ss:$0 sm:$0xff] }
  0x5c   :  { %563 = vmatprep.subr.bf16.mxu1 %v733_v0 }
  0x5d   :  { %541 = vmatpush3.bf16.msra.mxu0 %v540_v27 }
  0x5e   :  { %542 = vmatprep.subr.bf16.mxu0 %v733_v0 }
  0x5f   :  { %565 = vmatpush3.bf16.msra.mxu1 %v564_v36 }
  0x60   :  { %566 = vmatprep.subr.bf16.mxu1 %v733_v0 }
  0x61   :  { %544 = vmatpush3.bf16.msra.mxu0 %v543_v33 }
  0x62   :  { %545 = vmatprep.subr.bf16.mxu0 %v733_v0 }
  0x63   :  { %568 = vmatpush3.bf16.msra.mxu1 %v567_v42 }
  0x64   :  { %569 = vmatprep.subr.bf16.mxu1 %v733_v0 }
  0x65   :  { %547 = vmatpush3.bf16.msra.mxu0 %v546_v39 }
  0x66   :  { %548 = vmatprep.subr.bf16.mxu0 %v733_v0 }
  0x67   :  { %571 = vmatpush3.bf16.msra.mxu1 %v570_v46 }
  0x68   :  { %572 = vmatprep.subr.bf16.mxu1 %v733_v0 }
  0x69   :  { %550 = vmatpush3.bf16.msra.mxu0 %v549_v45 }
  0x6a   :  { %575 = vmatprep.subr.bf16.mxu0 %v733_v0 }
  0x6b   :  { %574 = vmatpush3.bf16.msra.mxu1 %v573_v50 }
  0x6c   :  { %455 = vmatmul.mubr.f32.vlgmr.msra.gmra.mrb[0].mxu0 %v74_v47 }
  0x6d   :  { %524 = vmatprep.mubr.msk.f32.mxu0 %vm734_vm0, %v735_v1  ;;  %577 = vmatpush3.bf16.msra.mxu0 %v576_v54  ;;  %v268_v1 = vld [vmem:[#allocation8 + $0x48] sm:$0xff] }
  0x6e   :  { %578 = vmatprep.subr.bf16.mxu0 %v733_v0  ;;  %v588_v2 = vpack.c.bf16 %v268_v1, %v267_v63 }
  0x71   :  { %580 = vmatpush3.bf16.msra.mxu0 %v579_v56 }
  0x72   :  { %581 = vmatprep.subr.bf16.mxu0 %v733_v0 }
  0x75   :  { %583 = vmatpush3.bf16.msra.mxu0 %v582_v59 }
  0x76   :  { %584 = vmatprep.subr.bf16.mxu0 %v733_v0 }
  0x79   :  { %586 = vmatpush3.bf16.msra.mxu0 %v585_v62 }
  0x7a   :  { %587 = vmatprep.subr.bf16.mxu0 %v733_v0 }
  0x7d   :  { %589 = vmatpush3.bf16.msra.mxu0 %v588_v2 }
  0x7e   :  { %590 = vmatprep.subr.bf16.mxu0 %v733_v0 }
  0x81   :  { %592 = vmatpush3.bf16.msra.mxu0 %v591_v5 }
  0x82   :  { %593 = vmatprep.subr.bf16.mxu0 %v733_v0 }
  0x85   :  { %595 = vmatpush3.bf16.msra.mxu0 %v594_v8 }
  0x86   :  { %596 = vmatprep.subr.bf16.mxu0 %v733_v0 }
  0x89   :  { %598 = vmatpush3.bf16.msra.mxu0 %v597_v16 }
 0x13f   :  { %v162_v10 = vpop.f32.mrb[0].mxu0 }
 0x140   :  { %v163_v11 = vadd.f32 %v368_v9, %v162_v10  ;;  %v456_v12 = vpop.f32.mrb[1].mxu0 }
 0x142   :  { %v166_v13 = vmax.f32 %v163_v11, 0.0 }
 0x144   :  { %490 = vmatmul.mubr.f32.vlgmr.msra.gmra.mrb[0].mxu1 %v166_v13 }
 0x217   :  { %v254_v18 = vpop.f32.mrb[0].mxu1 }
 0x218   :  { %v255_v19 = vadd.f32 %v369_v17, %v254_v18  ;;  %v491_v0 = vpop.f32.mrb[1].mxu1 }
 0x21a   :  { %v258_v20 = vmax.f32 %v255_v19, 0.0 }
 0x21c   :  { %525 = vmatmul.mubr.f32.vlgmr.msra.gmra.mrb[2].mxu0 %v258_v20 }
 0x2ef   :  { %v346_v22 = vpop.f32.mrb[2].mxu0 }
 0x2f0   :  { %v347_v23 = vadd.f32 %v370_v21, %v346_v22  ;;  %v526_v24 = vpop.f32.mrb[3].mxu0 }
 0x2f2   :  { %350 = vst [vmem:[#allocation10] sm:$0xff] %v347_v23 }
 0x2f3   :  { %708 = shalt.err (!%p705_p8)
}
 0x2f4   :  { %s709_s24 = scalar_lea.hbm %s880_s5, 128 }
 0x2f5   :  { %p710_p9 = scmp.ne.s32.totalorder %s880_s5, %s709_s24  ;;  %p713_p10 = scmp.lt.u32.totalorder %s709_s24, %s880_s5 }
 0x2f7   :  { %p715_p11 = pnand %p713_p10, %p710_p9 }
 0x2f9   :  { %718 = shalt.err (!%p715_p11)
}
 0x2fa   :  { %360 = dma.vmem_to_hbm [thread:$0]  %s358_s20, 128, %s880_s5, [#allocation4]  }
 0x2fb   :  { %725 = dma.done.wait [#allocation4], 128  }
 0x2fc   :  { %726 = vsyncadd [#allocation4], 4294967168 }
 0x2fd   :  { %364 = vsyncpa [#allocation3], 1 }
 0x2fe   :  { %365 = vsyncpa [#allocation6], 1 }
 0x2ff   :  { %366 = vsyncpa [#allocation9], 1 }
 0x300   :  { %367 = vsyncpa [#allocation4], 1 }

</bundles_post_ra>
